<compile_context>
chip_gen: v6e
topology: v6e:2x2x1
jax: 0.10.0
libtpu: 0.0.40
codegen_flags: <defaults>
</compile_context>

<pallas_src>
import jax
import jax.numpy as jnp
from jax.experimental import pallas as pl
from jax.experimental.pallas import tpu as pltpu


def _round_up(n, m):
    return (n + m - 1) // m * m


def _linear_self_attn_kernel(x_ref, mask_ref, w_ref, out_ref, acc_ref):
    # x_ref:    (TB, L, TH) input tile (native dtype; bf16 ok)
    # mask_ref: (TB, L)     int32 mask tile
    # w_ref:    (1, TH)     f32 weight chunk (VMEM-resident across batch steps)
    # out_ref:  (TB, L)     f32 softmax output
    # acc_ref:  (TB, L)     f32 score accumulator (persists across the H axis)
    k = pl.program_id(1)

    @pl.when(k == 0)
    def _init():
        acc_ref[...] = jnp.zeros_like(acc_ref)

    # Output-width-1 matvec kept off the MXU: VPU multiply + lane reduction over
    # the H chunk.  The f32 weight promotes the product, so accumulation is f32
    # regardless of x's dtype.
    x = x_ref[...]                      # (TB, L, TH)
    w = w_ref[0, :]                     # (TH,) f32
    acc_ref[...] += jnp.sum(x * w, axis=-1)

    @pl.when(k == pl.num_programs(1) - 1)
    def _finalize():
        # masked_fill_(x_mask == 0, -inf), then softmax over the length axis.
        scores = jnp.where(mask_ref[...] == 0, -jnp.inf, acc_ref[...])
        m = jnp.max(scores, axis=1, keepdims=True)
        e = jnp.exp(scores - m)
        s = jnp.sum(e, axis=1, keepdims=True)
        out_ref[...] = (e / s).astype(out_ref.dtype)   # exact normalization


_DEFAULT_X_BUDGET = 6 * 1024 * 1024   # per-pipeline-buffer bytes of x
_VMEM_LIMIT = 48 * 1024 * 1024        # explicit scoped-VMEM limit (<= v7x 64 MiB/TC)


def linear_self_attn(x, x_mask, weight, bias=None, *, tb=None,
                     x_compute_dtype=None, x_budget_bytes=_DEFAULT_X_BUDGET):
    """LinearSelfAttn forward.

    x: (B, L, H), x_mask: (B, L) int, weight: (1, H).  `bias` is accepted for
    API parity but ignored: softmax(scores + b) == softmax(scores).
    Returns alpha: (B, L) f32.  Fully-masked rows come out NaN (PyTorch parity).
    """
    del bias  # per-row constant shift: no effect on the softmax output

    B, L, H = x.shape
    if x_compute_dtype is not None:
        x = x.astype(x_compute_dtype)        # e.g. bf16: halves HBM read traffic
    x_mask = x_mask.astype(jnp.int32)
    weight = jnp.asarray(weight, jnp.float32).reshape(1, H)   # keep f32

    itemsize = jnp.dtype(x.dtype).itemsize

    # ---- H chunking: guarantee an (8, L, th) tile fits the per-buffer budget.
    if 8 * L * H * itemsize <= x_budget_bytes:
        th, h_pad = H, H
    else:
        th = max(128, (x_budget_bytes // (8 * L * itemsize)) // 128 * 128)
        th = min(th, _round_up(H, 128))
        h_pad = _round_up(H, th)
    # TODO(synk): extremely long L (8*L*128*itemsize > budget) would also need an
    # L-chunked online softmax; not implemented.

    # ---- Batch tile: biggest multiple of 8 under the budget, but aim for >= 2
    # grid steps (when the batch allows) so v7x can shard the "parallel" axis
    # over both TensorCores.
    row_bytes = L * th * itemsize
    max_tb = max(8, (x_budget_bytes // row_bytes) // 8 * 8)
    b_pad8 = _round_up(B, 8)
    if tb is None:
        target = _round_up(max(8, (b_pad8 + 1) // 2), 8) if b_pad8 >= 16 else b_pad8
        tb = min(max_tb, target)
    else:
        tb = min(max(8, _round_up(int(tb), 8)), max_tb)    # enforce (8,128) rules
    b_pad = _round_up(b_pad8, tb)

    # ---- Pad.  Zero-padded H contributes nothing to the scores; padded batch
    # rows get mask=1 / x=0 (finite uniform softmax) and are sliced off.
    if b_pad != B or h_pad != H:
        x = jnp.pad(x, ((0, b_pad - B), (0, 0), (0, h_pad - H)))
    if b_pad != B:
        x_mask = jnp.pad(x_mask, ((0, b_pad - B), (0, 0)), constant_values=1)
    if h_pad != H:
        weight = jnp.pad(weight, ((0, 0), (0, h_pad - H)))

    grid = (b_pad // tb, h_pad // th)

    cost = pl.CostEstimate(
        flops=2 * b_pad * L * h_pad + 5 * b_pad * L,
        transcendentals=b_pad * L,
        bytes_accessed=(b_pad * L * h_pad * itemsize   # x (dominant)
                        + b_pad * L * 4                # mask
                        + b_pad * L * 4                # out
                        + h_pad * 4),                  # weight
    )

    out = pl.pallas_call(
        _linear_self_attn_kernel,
        out_shape=jax.ShapeDtypeStruct((b_pad, L), jnp.float32),
        grid=grid,
        in_specs=[
            pl.BlockSpec((tb, L, th), lambda i, k: (i, 0, k)),   # x tile (pipelined)
            pl.BlockSpec((tb, L), lambda i, k: (i, 0)),          # mask tile
            pl.BlockSpec((1, th), lambda i, k: (0, k)),          # f32 weight chunk
        ],
        out_specs=pl.BlockSpec((tb, L), lambda i, k: (i, 0)),
        scratch_shapes=[pltpu.VMEM((tb, L), jnp.float32)],       # score accumulator
        compiler_params=pltpu.CompilerParams(
            dimension_semantics=("parallel", "arbitrary"),
            vmem_limit_bytes=_VMEM_LIMIT,
        ),
        cost_estimate=cost,
    )(x, x_mask, weight)

    return out[:B]


if __name__ == "__main__":
    batch, seq_len, hidden = 2, 8, 32

    key = jax.random.PRNGKey(0)
    kx, kw, kb = jax.random.split(key, 3)

    x = jax.random.normal(kx, (batch, seq_len, hidden), dtype=jnp.float32)

    # Mask: 1 = valid token, 0 = masked (filled with -inf before softmax).
    x_mask = jnp.ones((batch, seq_len), dtype=jnp.int32)
    x_mask = x_mask.at[0, 6:].set(0)   # first row: last 2 positions masked
    x_mask = x_mask.at[1, 5:].set(0)   # second row: last 3 positions masked

    # Deterministic init for nn.Linear(hidden, 1): weight (1, H), bias (1, 1).
    bound = 1.0 / jnp.sqrt(hidden)
    weight = jax.random.uniform(kw, (1, hidden), jnp.float32, -bound, bound)
    bias = jax.random.uniform(kb, (1, 1), jnp.float32, -bound, bound)

    alpha = jax.block_until_ready(linear_self_attn(x, x_mask, weight, bias))

    # Pure-JAX reference (exact f32 multiply+reduce; bias cancels in softmax).
    scores_ref = jnp.sum(x * weight[0], axis=-1) + bias[0, 0]
    scores_ref = jnp.where(x_mask == 0, -jnp.inf, scores_ref)
    alpha_ref = jax.nn.softmax(scores_ref, axis=1)
    assert alpha.shape == (batch, seq_len)
    assert jnp.allclose(alpha, alpha_ref, atol=1e-4, rtol=1e-4), "mismatch vs reference"
    assert jnp.allclose(alpha.sum(axis=1), 1.0, atol=1e-4), "rows do not sum to 1"

    # Exercise the batch-tiled + H-chunked accumulation path with a tiny budget.
    B2, L2, H2 = 16, 8, 256
    k2x, k2w, k2m = jax.random.split(jax.random.PRNGKey(0), 3)
    x2 = jax.random.normal(k2x, (B2, L2, H2), dtype=jnp.float32)
    w2 = jax.random.uniform(k2w, (1, H2), jnp.float32, -0.1, 0.1)
    m2 = (jax.random.uniform(k2m, (B2, L2)) > 0.3).astype(jnp.int32)
    m2 = m2.at[:, 0].set(1)   # keep every row at least partially unmasked
    alpha2 = jax.block_until_ready(
        linear_self_attn(x2, m2, w2, x_budget_bytes=40 * 1024))
    s2 = jnp.where(m2 == 0, -jnp.inf, jnp.sum(x2 * w2[0], axis=-1))
    alpha2_ref = jax.nn.softmax(s2, axis=1)
    assert alpha2.shape == (B2, L2)
    assert jnp.allclose(alpha2, alpha2_ref, atol=1e-4, rtol=1e-4), "chunked path mismatch"
    assert jnp.allclose(alpha2.sum(axis=1), 1.0, atol=1e-4)

    # TODO(synk): dropout is a no-op here (inference mode, p=0) — not implemented in-kernel.
    print("KERNEL_OK")
</pallas_src>

<mosaic_0001>
module attributes {stable_mosaic.version = 11 : i64} {
  func.func @_linear_self_attn_kernel(%arg0: i32, %arg1: i32, %arg2: memref<8x8x32xf32, #tpu.memory_space<vmem>>, %arg3: memref<8x8xi32, #tpu.memory_space<vmem>>, %arg4: memref<1x32xf32, #tpu.memory_space<vmem>>, %arg5: memref<8x8xf32, #tpu.memory_space<vmem>>, %arg6: memref<8x8xf32, #tpu.memory_space<vmem>>) attributes {dimension_semantics = [#tpu.dimension_semantics<parallel>, #tpu.dimension_semantics<arbitrary>], iteration_bounds = array<i64: 1, 1>, scalar_prefetch = 0 : i64, scratch_operands = 1 : i64, tpu.core_type = #tpu.core_type<tc>, window_params = [{transform_indices = @transform_0, window_bounds = array<i64: 8, 8, 32>}, {transform_indices = @transform_1, window_bounds = array<i64: 8, 8>}, {transform_indices = @transform_2, window_bounds = array<i64: 1, 32>}, {transform_indices = @transform_3, window_bounds = array<i64: 8, 8>}]} {
    %c0_i32 = arith.constant 0 : i32
    %0 = arith.cmpi eq, %arg1, %c0_i32 : i32
    %1 = arith.extui %0 : i1 to i32
    %c0_i32_0 = arith.constant 0 : i32
    %2 = arith.cmpi ne, %1, %c0_i32_0 : i32
    scf.if %2 {
      %cst_11 = arith.constant 0.000000e+00 : f32
      %16 = vector.broadcast %cst_11 : f32 to vector<8x8xf32>
      %c0_12 = arith.constant 0 : index
      %c0_13 = arith.constant 0 : index
      %17 = vector.load %arg6[%c0_12, %c0_13] : memref<8x8xf32, #tpu.memory_space<vmem>>, vector<8x8xf32>
      tpu.vector_store %arg6[%c0_12, %c0_13], %16 {strides = array<i32>} : memref<8x8xf32, #tpu.memory_space<vmem>>, vector<8x8xf32>,
    } else {
    }
    %c0 = arith.constant 0 : index
    %c0_1 = arith.constant 0 : index
    %c0_2 = arith.constant 0 : index
    %3 = vector.load %arg2[%c0, %c0_1, %c0_2] : memref<8x8x32xf32, #tpu.memory_space<vmem>>, vector<8x8x32xf32>
    %c0_3 = arith.constant 0 : index
    %c0_4 = arith.constant 0 : index
    %4 = vector.load %arg4[%c0_3, %c0_4] : memref<1x32xf32, #tpu.memory_space<vmem>>, vector<1x32xf32>
    %5 = vector.shape_cast %4 : vector<1x32xf32> to vector<32xf32>
    %c0_5 = arith.constant 0 : index
    %c0_6 = arith.constant 0 : index
    %6 = vector.load %arg6[%c0_5, %c0_6] : memref<8x8xf32, #tpu.memory_space<vmem>>, vector<8x8xf32>
    %7 = vector.shape_cast %5 : vector<32xf32> to vector<1x1x32xf32>
    %8 = vector.broadcast %7 : vector<1x1x32xf32> to vector<8x8x32xf32>
    %9 = arith.mulf %3, %8 : vector<8x8x32xf32>
    %cst = arith.constant dense<0.000000e+00> : vector<8x8xf32>
    %10 = vector.multi_reduction <add>, %9, %cst [2] : vector<8x8x32xf32> to vector<8x8xf32>
    %11 = arith.addf %6, %10 : vector<8x8xf32>
    %c0_7 = arith.constant 0 : index
    %c0_8 = arith.constant 0 : index
    %12 = vector.load %arg6[%c0_7, %c0_8] : memref<8x8xf32, #tpu.memory_space<vmem>>, vector<8x8xf32>
    tpu.vector_store %arg6[%c0_7, %c0_8], %11 {strides = array<i32>} : memref<8x8xf32, #tpu.memory_space<vmem>>, vector<8x8xf32>,
    %c0_i32_9 = arith.constant 0 : i32
    %13 = arith.cmpi eq, %arg1, %c0_i32_9 : i32
    %14 = arith.extui %13 : i1 to i32
    %c0_i32_10 = arith.constant 0 : i32
    %15 = arith.cmpi ne, %14, %c0_i32_10 : i32
    scf.if %15 {
      %c0_11 = arith.constant 0 : index
      %c0_12 = arith.constant 0 : index
      %16 = vector.load %arg3[%c0_11, %c0_12] : memref<8x8xi32, #tpu.memory_space<vmem>>, vector<8x8xi32>
      %c0_i32_13 = arith.constant 0 : i32
      %17 = vector.broadcast %c0_i32_13 : i32 to vector<8x8xi32>
      %18 = arith.cmpi eq, %16, %17 : vector<8x8xi32>
      %c0_14 = arith.constant 0 : index
      %c0_15 = arith.constant 0 : index
      %19 = vector.load %arg6[%c0_14, %c0_15] : memref<8x8xf32, #tpu.memory_space<vmem>>, vector<8x8xf32>
      %cst_16 = arith.constant 0xFF800000 : f32
      %20 = vector.broadcast %cst_16 : f32 to vector<8x8xf32>
      %21 = arith.select %18, %20, %19 : vector<8x8xi1>, vector<8x8xf32>
      %cst_17 = arith.constant dense<0xFF800000> : vector<8xf32>
      %22 = vector.multi_reduction <maximumf>, %21, %cst_17 [1] : vector<8x8xf32> to vector<8xf32>
      %23 = vector.shape_cast %22 : vector<8xf32> to vector<8x1xf32>
      %24 = vector.broadcast %23 : vector<8x1xf32> to vector<8x8xf32>
      %25 = arith.subf %21, %24 : vector<8x8xf32>
      %26 = math.exp %25 : vector<8x8xf32>
      %cst_18 = arith.constant dense<0.000000e+00> : vector<8xf32>
      %27 = vector.multi_reduction <add>, %26, %cst_18 [1] : vector<8x8xf32> to vector<8xf32>
      %28 = vector.shape_cast %27 : vector<8xf32> to vector<8x1xf32>
      %29 = vector.broadcast %28 : vector<8x1xf32> to vector<8x8xf32>
      %30 = arith.divf %26, %29 : vector<8x8xf32>
      %c0_19 = arith.constant 0 : index
      %c0_20 = arith.constant 0 : index
      %31 = vector.load %arg5[%c0_19, %c0_20] : memref<8x8xf32, #tpu.memory_space<vmem>>, vector<8x8xf32>
      tpu.vector_store %arg5[%c0_19, %c0_20], %30 {strides = array<i32>} : memref<8x8xf32, #tpu.memory_space<vmem>>, vector<8x8xf32>,
    } else {
    }
    return
  }
  func.func @transform_0(%arg0: i32, %arg1: i32) -> (i32, i32, i32) {
    %c0_i32 = arith.constant 0 : i32
    %c0_i32_0 = arith.constant 0 : i32
    return %arg0, %c0_i32, %arg1 : i32, i32, i32
  }
  func.func @transform_1(%arg0: i32, %arg1: i32) -> (i32, i32) {
    %c0_i32 = arith.constant 0 : i32
    %c0_i32_0 = arith.constant 0 : i32
    return %arg0, %c0_i32 : i32, i32
  }
  func.func @transform_2(%arg0: i32, %arg1: i32) -> (i32, i32) {
    %c0_i32 = arith.constant 0 : i32
    %c0_i32_0 = arith.constant 0 : i32
    return %c0_i32, %arg1 : i32, i32
  }
  func.func @transform_3(%arg0: i32, %arg1: i32) -> (i32, i32) {
    %c0_i32 = arith.constant 0 : i32
    %c0_i32_0 = arith.constant 0 : i32
    return %arg0, %c0_i32 : i32, i32
  }
}

</mosaic_0001>

<bundles_post_ra>
// kernel: tpu_custom_call.1
= control target key start
LH: loop header
LB: loop body
LE: loop exit
PB: predicated region body
PF: predicated region fallthrough
CT: control target
= control target key end

     0   :  { %8 = vsyncpa [#allocation4], 0  ;;  %s319_s0 = inlined_call_operand.hbm [shape: f32[8,8,32], index: 0, kind: input, shape index: {}]   ;;  %s320_s1 = inlined_call_operand.hbm [shape: s32[8,8], index: 1, kind: input, shape index: {}]   ;;  %s321_s2 = inlined_call_operand.vmem [shape: f32[1,32], index: 2, kind: input, shape index: {}]   ;;  %s322_s3 = inlined_call_operand.hbm [shape: f32[8,8], index: 3, kind: output, shape index: {}]  }
   0x1   :  { %9 = vsyncpa [#allocation7], 0 }
   0x2   :  { %10 = vsyncpa [#allocation5], 0  ;;  %s268_s12 = smov [#allocation3]  }
   0x3   :  { %s16_s13 = sshll.u32 %s268_s12, 4  ;;  %s17_s13 = int_to_ptr.vmem [resolvable:$true] %s16_s13 }
   0x4   :  { %s210_s14 = scalar_lea.vmem %s17_s13, 1024  ;;  %p215_p1 = scmp.lt.s32.totalorder %s17_s13, %s17_s13 }
   0x5   :  { %p211_p0 = scmp.ne.s32.totalorder %s17_s13, %s210_s14  ;;  %p216_p2 = scmp.lt.s32.totalorder %s210_s14, %s210_s14 }
   0x7   :  { %p217_p3 = por %p216_p2, %p215_p1 }
   0x9   :  { %p218_p4 = pnand %p217_p3, %p211_p0 }
   0xb   :  { %221 = shalt.err (!%p218_p4)
}
   0xc   :  { %s269_s15 = smov 128   ;;  %s270_s16 = smov 8  }
   0xd   :  { %22 = dma.hbm_to_vmem [thread:$0]  %s319_s0, 1024, %s17_s13, [#allocation4], %s269_s15, %s269_s15, %s270_s16  }
   0xe   :  { %s271_s19 = smov [#allocation6]  }
   0xf   :  { %s29_s20 = sshll.u32 %s271_s19, 4  ;;  %s30_s20 = int_to_ptr.vmem [resolvable:$true] %s29_s20 }
  0x10   :  { %s230_s21 = scalar_lea.vmem %s30_s20, 128  ;;  %p235_p6 = scmp.lt.s32.totalorder %s30_s20, %s30_s20 }
  0x11   :  { %p231_p5 = scmp.ne.s32.totalorder %s30_s20, %s230_s21  ;;  %p236_p7 = scmp.lt.s32.totalorder %s230_s21, %s230_s21 }
  0x13   :  { %p237_p8 = por %p236_p7, %p235_p6 }
  0x15   :  { %p238_p9 = pnand %p237_p8, %p231_p5 }
  0x17   :  { %241 = shalt.err (!%p238_p9)
}
  0x18   :  { %32 = dma.hbm_to_vmem [thread:$0]  %s320_s1, 128, %s30_s20, [#allocation7]  }
  0x19   :  { %262 = dma.done.wait [#allocation4], 1024  }
  0x1a   :  { %263 = vsyncadd [#allocation4], 4294966272 }
  0x1b   :  { %264 = dma.done.wait [#allocation7], 128  }
  0x1c   :  { %265 = vsyncadd [#allocation7], 4294967168  ;;  %v47_v0 = vld [vmem:[#allocation3] sm:$0xff]  ;;  %v191_v1 = vld [vmem:[%s321_s2] ss:$0 sm:$0xff]  ;;  %vm71_vm0 = vcmask 261120   ;;  %v104_v26 = vlaneseq }
  0x1d   :  { %v49_v2 = vld [vmem:[#allocation3 + $0x10] sm:$0xff]  ;;  %v63_v3 = vmul.f32 %v191_v1, %v47_v0  ;;  %v48_v5 = vld [vmem:[#allocation3 + $0x8] sm:$0xff]  ;;  %v50_v6 = vld [vmem:[#allocation3 + $0x18] sm:$0xff]  ;;  %vm45_vm1 = vcmask 64512   ;;  %v272_v25 = vmov 0.0   ;;  %vm138_vm2 = vcmask 1041409  }
  0x1e   :  { %v65_v4 = vmul.f32 %v191_v1, %v49_v2  ;;  %v64_v7 = vmul.f32 %v191_v1, %v48_v5  ;;  %v66_v8 = vmul.f32 %v191_v1, %v50_v6  ;;  %v51_v9 = vld [vmem:[#allocation3 + $0x20] sm:$0xff]  ;;  %v52_v10 = vld [vmem:[#allocation3 + $0x28] sm:$0xff]  ;;  %v53_v17 = vld [vmem:[#allocation3 + $0x30] sm:$0xff]  ;;  %46 = vst.msk [vmem:[#allocation2] sm:$0xff] %vm45_vm1, %v272_v25  ;;  %v105_v27 = vand.u32 127, %v104_v26  ;;  %s273_s1 = smov [#allocation8]  }
  0x1f   :  { %v72_v11 = vsel %vm71_vm0, %v63_v3, 0.0  ;;  %v67_v15 = vmul.f32 %v191_v1, %v51_v9  ;;  %v68_v16 = vmul.f32 %v191_v1, %v52_v10  ;;  %v54_v18 = vld [vmem:[#allocation3 + $0x38] sm:$0xff]  ;;  %v69_v21 = vmul.f32 %v191_v1, %v53_v17  ;;  %v159_v55 = vld [vmem:[#allocation6] sm:$0xff]  ;;  %s181_s2 = sshll.u32 %s273_s1, 4  ;;  %s182_s2 = int_to_ptr.vmem [resolvable:$true] %s181_s2 }
  0x20   :  { %v78_v12 = vsel %vm71_vm0, %v65_v4, 0.0  ;;  %73 = vadd.xlane.f32.xlu0 %v72_v11  ;;  %v75_v13 = vsel %vm71_vm0, %v64_v7, 0.0  ;;  %v81_v14 = vsel %vm71_vm0, %v66_v8, 0.0  ;;  %v70_v22 = vmul.f32 %v191_v1, %v54_v18  ;;  %s242_s25 = scalar_lea.vmem %s182_s2, 128  ;;  %p247_p11 = scmp.lt.s32.totalorder %s182_s2, %s182_s2 }
  0x21   :  { %79 = vadd.xlane.f32.xlu1 %v78_v12  ;;  %v84_v19 = vsel %vm71_vm0, %v67_v15, 0.0  ;;  %v87_v20 = vsel %vm71_vm0, %v68_v16, 0.0  ;;  %v90_v23 = vsel %vm71_vm0, %v69_v21, 0.0  ;;  %v107_v28 = vshrl.u32 %v104_v26, 7  ;;  %p243_p10 = scmp.ne.s32.totalorder %s182_s2, %s242_s25  ;;  %p248_p12 = scmp.lt.s32.totalorder %s242_s25, %s242_s25 }
  0x22   :  { %v93_v24 = vsel %vm71_vm0, %v70_v22, 0.0  ;;  %vm140_vm3 = vcmask 1042434   ;;  %vm142_vm4 = vcmask 1043459   ;;  %vm144_vm5 = vcmask 1044484  }
  0x23   :  { %v108_v31 = vsub.s32 %v105_v27, %v107_v28  ;;  %vm146_vm6 = vcmask 1045509   ;;  %vm148_vm7 = vcmask 1046534   ;;  %vm150_vm8 = vcmask 1047559   ;;  %p249_p13 = por %p248_p12, %p247_p11 }
  0x24   :  { %76 = vadd.xlane.f32.xlu0 %v75_v13  ;;  %vm160_vm9 = vcmp.eq.s32.totalorder %v159_v55, 0 }
  0x25   :  { %82 = vadd.xlane.f32.xlu1 %v81_v14  ;;  %v56_v51 = vld [vmem:[#allocation2] sm:$0xff]  ;;  %p250_p0 = pnand %p249_p13, %p243_p10 }
  0x28   :  { %85 = vadd.xlane.f32.xlu0 %v84_v19 }
  0x29   :  { %88 = vadd.xlane.f32.xlu1 %v87_v20 }
  0x2c   :  { %91 = vadd.xlane.f32.xlu0 %v90_v23 }
  0x2d   :  { %94 = vadd.xlane.f32.xlu1 %v93_v24 }
  0xa9   :  { %v74_v29 = vpop.xlane.xlu0 %73 }
  0xaa   :  { %v80_v30 = vpop.xlane.xlu1 %79  ;;  %v109_v34 = vrot.slane %v74_v29, %v108_v31 }
  0xab   :  { %v117_v37 = vrot.slane %v80_v30, %v108_v31 }
  0xad   :  { %v77_v32 = vpop.xlane.xlu0 %76 }
  0xae   :  { %v83_v33 = vpop.xlane.xlu1 %82  ;;  %v113_v35 = vrot.slane %v77_v32, %v108_v31 }
  0xaf   :  { %v121_v36 = vrot.slane %v83_v33, %v108_v31 }
  0xb0   :  { %v139_v38 = vsel %vm138_vm2, %v113_v35, %v109_v34 }
  0xb1   :  { %v141_v39 = vsel %vm140_vm3, %v117_v37, %v139_v38  ;;  %v86_v40 = vpop.xlane.xlu0 %85 }
  0xb2   :  { %v89_v41 = vpop.xlane.xlu1 %88  ;;  %v143_v42 = vsel %vm142_vm4, %v121_v36, %v141_v39  ;;  %v125_v43 = vrot.slane %v86_v40, %v108_v31 }
  0xb3   :  { %v129_v44 = vrot.slane %v89_v41, %v108_v31 }
  0xb4   :  { %v145_v45 = vsel %vm144_vm5, %v125_v43, %v143_v42 }
  0xb5   :  { %v92_v46 = vpop.xlane.xlu0 %91  ;;  %v147_v50 = vsel %vm146_vm6, %v129_v44, %v145_v45 }
  0xb6   :  { %v95_v47 = vpop.xlane.xlu1 %94  ;;  %v133_v48 = vrot.slane %v92_v46, %v108_v31 }
  0xb7   :  { %v137_v49 = vrot.slane %v95_v47, %v108_v31 }
  0xb8   :  { %v149_v52 = vsel %vm148_vm7, %v133_v48, %v147_v50 }
  0xb9   :  { %v151_v53 = vsel %vm150_vm8, %v137_v49, %v149_v52 }
  0xba   :  { %v153_v54 = vadd.f32 %v151_v53, %v56_v51 }
  0xbc   :  { %155 = vst.msk [vmem:[#allocation2] sm:$0xff] %vm45_vm1, %v153_v54 }
  0xc3   :  { %v161_v56 = vld [vmem:[#allocation2] sm:$0xff] }
  0xc4   :  { %v162_v57 = vsel %vm160_vm9, -inf, %v161_v56 }
  0xc5   :  { %v163_v58 = vsel %vm45_vm1, %v162_v57, -inf }
  0xc6   :  { %164 = vmax.xlane.f32.xlu0 %v163_v58 }
 0x14f   :  { %v165_v59 = vpop.xlane.xlu0 %164 }
 0x150   :  { %v166_v60 = vsub.f32 %v162_v57, %v165_v59 }
 0x152   :  { %v167_v61 = vmul.f32 1.442695, %v166_v60 }
 0x154   :  { %198 = vpow2.f32 %v167_v61 }
 0x161   :  { %v199_v62 = vpop.eup %198 }
 0x162   :  { %v169_v63 = vsel %vm45_vm1, %v199_v62, 0.0 }
 0x163   :  { %170 = vadd.xlane.f32.xlu1 %v169_v63 }
 0x1ec   :  { %v171_v0 = vpop.xlane.xlu1 %170 }
 0x1ed   :  { %200 = vrcp.f32 %v171_v0 }
 0x1fa   :  { %v201_v1 = vpop.eup %200 }
 0x1fb   :  { %v173_v2 = vmul.f32 %v201_v1, %v199_v62 }
 0x1fd   :  { %174 = vst.msk [vmem:[#allocation8] sm:$0xff] %vm45_vm1, %v173_v2 }
 0x1fe   :  { %253 = shalt.err (!%p250_p0)
}
 0x1ff   :  { %184 = dma.vmem_to_hbm [thread:$0]  %s182_s2, 128, %s322_s3, [#allocation5]  }
 0x200   :  { %266 = dma.done.wait [#allocation5], 128  }
 0x201   :  { %267 = vsyncadd [#allocation5], 4294967168 }
 0x202   :  { %188 = vsyncpa [#allocation4], 1 }
 0x203   :  { %189 = vsyncpa [#allocation7], 1 }
 0x204   :  { %190 = vsyncpa [#allocation5], 1 }

</bundles_post_ra>
